<compile_context>
chip_gen: v7x
topology: tpu7x:2x2x1
jax: 0.10.0
libtpu: 0.0.40
codegen_flags: <defaults>
</compile_context>

<pallas_src>
import jax
import jax.numpy as jnp
from jax.experimental import pallas as pl
from jax.experimental.pallas import tpu as pltpu


# ----------------------------------------------------------------------------
# Pallas kernel: one step, all samples at once.
#   e_ref   : (noise_dim, S*M)  noise, transposed layout
#   w1e_ref : (H, noise_dim)    noise-columns of the first Linear's weight
#   zc_ref  : (H, S*M)          precomputed W1_z @ z.T + b1, tiled over samples
#   w2_ref  : (H, 1)            second Linear's weight (output_dim == 1)
#   b2_ref  : (1, 1)            second Linear's bias
#   o_ref   : (1, S*M)          lane-dense output row
# ----------------------------------------------------------------------------
def _stein_mlp_kernel(e_ref, w1e_ref, zc_ref, w2_ref, b2_ref, o_ref):
    # First Linear: noise part on the MXU + hoisted inducing-point part + bias.
    pre = jnp.dot(w1e_ref[...], e_ref[...],
                  preferred_element_type=jnp.float32) + zc_ref[...]   # (H, S*M)
    h = jax.nn.sigmoid(pre)                                           # EUP exp
    # Second Linear (16 -> 1): VPU multiply + sublane reduction (avoid MXU N=1).
    y = jnp.sum(h * w2_ref[...], axis=0, keepdims=True) + b2_ref[...]  # (1, S*M)
    o_ref[...] = y.astype(o_ref.dtype)


def stein_transform(e_t, w1e_t, zc_t, w2_col, b2):
    """Single-step Pallas call: Linear -> Sigmoid -> Linear for all samples at once.

    e_t:   (noise_dim, S*M) float32
    w1e_t: (H, noise_dim)
    zc_t:  (H, S*M)          (sample-invariant first-layer term, pre-tiled)
    w2_col:(H, 1)
    b2:    (1, 1)
    returns: (1, S*M) float32
    """
    nd, sm = e_t.shape
    h = w1e_t.shape[0]
    return pl.pallas_call(
        _stein_mlp_kernel,
        out_shape=jax.ShapeDtypeStruct((1, sm), jnp.float32),
        grid=(1,),
        in_specs=[
            pl.BlockSpec((nd, sm), lambda i: (0, 0)),
            pl.BlockSpec((h, nd), lambda i: (0, 0)),
            pl.BlockSpec((h, sm), lambda i: (0, 0)),
            pl.BlockSpec((h, 1), lambda i: (0, 0)),
            pl.BlockSpec((1, 1), lambda i: (0, 0)),
        ],
        out_specs=pl.BlockSpec((1, sm), lambda i: (0, 0)),
        compiler_params=pltpu.CompilerParams(
            dimension_semantics=("arbitrary",)),
    )(e_t, w1e_t, zc_t, w2_col, b2)


# ----------------------------------------------------------------------------
# SteinGenerator (JAX wrapper) — glue in plain JAX, hot path in Pallas.
# ----------------------------------------------------------------------------
class SteinGeneratorJAX:
    def __init__(self, key, *, sample_times, noise_dim, inducing_size,
                 input_dim, output_dim, inducing_points):
        self.sample_times = sample_times
        self.noise_dim = noise_dim
        self.inducing_size = inducing_size
        self.input_dim = input_dim
        self.output_dim = 1 if output_dim is None else output_dim
        # Config flags for the implemented branch.
        self.vector_type = False
        self.noise_add = True
        self.noise_share = False
        self.multi_head = False
        self.concat_type = True
        # TODO(synk): only this flag combination (and output_dim == 1) is lowered to
        # Pallas; other branches follow the same MLP pattern with different shapes.
        assert self.output_dim == 1, "Pallas path implemented for output_dim == 1"

        self.inducing_points = inducing_points  # (inducing_size, input_dim)

        d_in = self.noise_dim + self.input_dim
        hidden = 16
        d_out = self.output_dim
        self.hidden = hidden

        k1, k2, k3, k4 = jax.random.split(key, 4)
        # PyTorch nn.Linear default init: U(-1/sqrt(fan_in), 1/sqrt(fan_in)),
        # weights stored in PyTorch (out_features, in_features) layout.
        lim1 = 1.0 / jnp.sqrt(jnp.float32(d_in))
        lim2 = 1.0 / jnp.sqrt(jnp.float32(hidden))
        self.w1 = jax.random.uniform(k1, (hidden, d_in), jnp.float32, -lim1, lim1)
        self.b1 = jax.random.uniform(k2, (hidden,), jnp.float32, -lim1, lim1)
        self.w2 = jax.random.uniform(k3, (d_out, hidden), jnp.float32, -lim2, lim2)
        self.b2 = jax.random.uniform(k4, (d_out,), jnp.float32, -lim2, lim2)

    def forward(self, noise_key, shared_list=None, transformed_list=None):
        S, M, nd, H = (self.sample_times, self.inducing_size,
                       self.noise_dim, self.hidden)

        # noise_add=True, noise_share=False: e ~ N(0, I), drawn in one batched call,
        # directly in the transposed (feature, row) layout used by the kernel.
        e_t = jax.random.normal(noise_key, (nd, S * M), jnp.float32)

        z = jnp.reshape(self.inducing_points, (M, self.input_dim))

        # Hoist the sample-invariant part of the first Linear:
        #   W1_z @ z.T + b1  -> (H, M), tiled across samples -> (H, S*M).
        zc_t = jnp.dot(self.w1[:, nd:], z.T) + self.b1[:, None]
        zc_t = jnp.tile(zc_t, (1, S))

        w1e_t = self.w1[:, :nd]                      # (H, noise_dim)
        w2_col = jnp.reshape(self.w2, (H, 1))        # (H, 1)
        b2 = jnp.reshape(self.b2, (1, 1))            # (1, 1)

        y = stein_transform(e_t, w1e_t, zc_t, w2_col, b2)        # (1, S*M)

        u_all = jnp.reshape(y, (S, M * self.output_dim))
        u_list = [u_all[s] for s in range(S)]
        return u_list, z


if __name__ == "__main__":
    key = jax.random.PRNGKey(0)
    k_params, k_inducing, k_noise = jax.random.split(key, 3)

    sample_times = 4
    noise_dim = 8
    inducing_size = 16
    input_dim = 4
    output_dim = 1

    inducing_points = jax.random.normal(
        k_inducing, (inducing_size, input_dim), jnp.float32)

    gen = SteinGeneratorJAX(
        k_params,
        sample_times=sample_times,
        noise_dim=noise_dim,
        inducing_size=inducing_size,
        input_dim=input_dim,
        output_dim=output_dim,
        inducing_points=inducing_points,
    )

    u_list, z = gen.forward(k_noise)
    jax.block_until_ready(u_list)
    jax.block_until_ready(z)

    assert len(u_list) == sample_times
    assert all(u.shape == (inducing_size * output_dim,) for u in u_list)
    assert z.shape == (inducing_size, input_dim)

    # Pure-JAX reference check (same deterministic noise draw as forward()).
    e_t_ref = jax.random.normal(
        k_noise, (noise_dim, sample_times * inducing_size), jnp.float32)
    z_ref = jnp.reshape(inducing_points, (inducing_size, input_dim))
    for s in range(sample_times):
        e_s = e_t_ref[:, s * inducing_size:(s + 1) * inducing_size].T   # (M, nd)
        e_z = jnp.concatenate([e_s, z_ref], axis=1)                     # (M, d_in)
        h = jax.nn.sigmoid(e_z @ gen.w1.T + gen.b1)                     # (M, H)
        u_ref = jnp.reshape(h @ gen.w2.T + gen.b2, (-1,))               # (M,)
        assert jnp.allclose(u_list[s], u_ref, atol=1e-5, rtol=1e-5)

    print("KERNEL_OK")
</pallas_src>

<mosaic_0001>
module attributes {stable_mosaic.version = 11 : i64} {
  func.func @_stein_mlp_kernel(%arg0: i32, %arg1: memref<8x64xf32, #tpu.memory_space<vmem>>, %arg2: memref<16x8xf32, #tpu.memory_space<vmem>>, %arg3: memref<16x64xf32, #tpu.memory_space<vmem>>, %arg4: memref<16x1xf32, #tpu.memory_space<vmem>>, %arg5: memref<1x1xf32, #tpu.memory_space<vmem>>, %arg6: memref<1x64xf32, #tpu.memory_space<vmem>>) attributes {dimension_semantics = [#tpu.dimension_semantics<arbitrary>], iteration_bounds = array<i64: 1>, scalar_prefetch = 0 : i64, scratch_operands = 0 : i64, tpu.core_type = #tpu.core_type<tc>, window_params = [{pipeline_mode = #tpu.pipeline_mode<synchronous>, transform_indices = @transform_0, window_bounds = array<i64: 8, 64>}, {pipeline_mode = #tpu.pipeline_mode<synchronous>, transform_indices = @transform_1, window_bounds = array<i64: 16, 8>}, {pipeline_mode = #tpu.pipeline_mode<synchronous>, transform_indices = @transform_2, window_bounds = array<i64: 16, 64>}, {pipeline_mode = #tpu.pipeline_mode<synchronous>, transform_indices = @transform_3, window_bounds = array<i64: 16, 1>}, {pipeline_mode = #tpu.pipeline_mode<synchronous>, transform_indices = @transform_4, window_bounds = array<i64: 1, 1>}, {pipeline_mode = #tpu.pipeline_mode<synchronous>, transform_indices = @transform_5, window_bounds = array<i64: 1, 64>}]} {
    %c0 = arith.constant 0 : index
    %c0_0 = arith.constant 0 : index
    %0 = vector.load %arg2[%c0, %c0_0] : memref<16x8xf32, #tpu.memory_space<vmem>>, vector<16x8xf32>
    %c0_1 = arith.constant 0 : index
    %c0_2 = arith.constant 0 : index
    %1 = vector.load %arg1[%c0_1, %c0_2] : memref<8x64xf32, #tpu.memory_space<vmem>>, vector<8x64xf32>
    %cst = arith.constant dense<0.000000e+00> : vector<16x64xf32>
    %2 = tpu.matmul %0, %1, %cst {dimension_numbers = #tpu.dot_dimension_numbers<[1], [0], [0], [1], [0, 0, 1, 1], [], []>} : vector<16x8xf32>, vector<8x64xf32>, vector<16x64xf32> -> vector<16x64xf32>
    %c0_3 = arith.constant 0 : index
    %c0_4 = arith.constant 0 : index
    %3 = vector.load %arg3[%c0_3, %c0_4] : memref<16x64xf32, #tpu.memory_space<vmem>>, vector<16x64xf32>
    %4 = arith.addf %2, %3 : vector<16x64xf32>
    %5 = arith.negf %4 : vector<16x64xf32>
    %6 = math.exp %5 : vector<16x64xf32>
    %cst_5 = arith.constant 1.000000e+00 : f32
    %7 = vector.broadcast %cst_5 : f32 to vector<16x64xf32>
    %8 = arith.addf %7, %6 : vector<16x64xf32>
    %9 = arith.divf %7, %8 : vector<16x64xf32>
    %c0_6 = arith.constant 0 : index
    %c0_7 = arith.constant 0 : index
    %10 = vector.load %arg4[%c0_6, %c0_7] : memref<16x1xf32, #tpu.memory_space<vmem>>, vector<16x1xf32>
    %11 = vector.broadcast %10 : vector<16x1xf32> to vector<16x64xf32>
    %12 = arith.mulf %9, %11 : vector<16x64xf32>
    %cst_8 = arith.constant dense<0.000000e+00> : vector<64xf32>
    %13 = vector.multi_reduction <add>, %12, %cst_8 [0] : vector<16x64xf32> to vector<64xf32>
    %14 = vector.shape_cast %13 : vector<64xf32> to vector<1x64xf32>
    %c0_9 = arith.constant 0 : index
    %c0_10 = arith.constant 0 : index
    %15 = vector.load %arg5[%c0_9, %c0_10] : memref<1x1xf32, #tpu.memory_space<vmem>>, vector<1x1xf32>
    %16 = vector.broadcast %15 : vector<1x1xf32> to vector<1x64xf32>
    %17 = arith.addf %14, %16 : vector<1x64xf32>
    %c0_11 = arith.constant 0 : index
    %c0_12 = arith.constant 0 : index
    %18 = vector.load %arg6[%c0_11, %c0_12] : memref<1x64xf32, #tpu.memory_space<vmem>>, vector<1x64xf32>
    tpu.vector_store %arg6[%c0_11, %c0_12], %17 {strides = array<i32>} : memref<1x64xf32, #tpu.memory_space<vmem>>, vector<1x64xf32>,
    return
  }
  func.func @transform_0(%arg0: i32) -> (i32, i32) {
    %c0_i32 = arith.constant 0 : i32
    %c0_i32_0 = arith.constant 0 : i32
    %c0_i32_1 = arith.constant 0 : i32
    return %c0_i32, %c0_i32_0 : i32, i32
  }
  func.func @transform_1(%arg0: i32) -> (i32, i32) {
    %c0_i32 = arith.constant 0 : i32
    %c0_i32_0 = arith.constant 0 : i32
    %c0_i32_1 = arith.constant 0 : i32
    return %c0_i32, %c0_i32_0 : i32, i32
  }
  func.func @transform_2(%arg0: i32) -> (i32, i32) {
    %c0_i32 = arith.constant 0 : i32
    %c0_i32_0 = arith.constant 0 : i32
    %c0_i32_1 = arith.constant 0 : i32
    return %c0_i32, %c0_i32_0 : i32, i32
  }
  func.func @transform_3(%arg0: i32) -> (i32, i32) {
    %c0_i32 = arith.constant 0 : i32
    %c0_i32_0 = arith.constant 0 : i32
    %c0_i32_1 = arith.constant 0 : i32
    return %c0_i32, %c0_i32_0 : i32, i32
  }
  func.func @transform_4(%arg0: i32) -> (i32, i32) {
    %c0_i32 = arith.constant 0 : i32
    %c0_i32_0 = arith.constant 0 : i32
    %c0_i32_1 = arith.constant 0 : i32
    return %c0_i32, %c0_i32_0 : i32, i32
  }
  func.func @transform_5(%arg0: i32) -> (i32, i32) {
    %c0_i32 = arith.constant 0 : i32
    %c0_i32_0 = arith.constant 0 : i32
    %c0_i32_1 = arith.constant 0 : i32
    return %c0_i32, %c0_i32_0 : i32, i32
  }
}

</mosaic_0001>

<bundles_post_ra>
// kernel: tpu_custom_call.1
= control target key start
LH: loop header
LB: loop body
LE: loop exit
PB: predicated region body
PF: predicated region fallthrough
CT: control target
= control target key end

     0   :  { %s289_s0 = inlined_call_operand.vmem [shape: f32[8,64], index: 0, kind: input, shape index: {}]   ;;  %s290_s1 = inlined_call_operand.vmem [shape: f32[16,8], index: 1, kind: input, shape index: {}]   ;;  %s291_s2 = inlined_call_operand.vmem [shape: f32[16,64], index: 2, kind: input, shape index: {}]   ;;  %s292_s3 = inlined_call_operand.vmem [shape: f32[16,1], index: 3, kind: input, shape index: {}]   ;;  %s293_s4 = inlined_call_operand.<no memory space> [shape: f32[1,1], index: 4, kind: input, shape index: {}]   ;;  %s294_s5 = inlined_call_operand.hbm [shape: f32[1,64], index: 5, kind: output, shape index: {}]  }
   0x1   :  { %v10_v0 = vstv %s293_s4 }
   0x2   :  { %11 = vst [vmem:[#allocation2] sm:$0x1] %v10_v0 }
   0x3   :  { %v25_v1 = vld [vmem:[%s289_s0] sm:$0xff]  ;;  %vm28_vm0 = vcmask 64512   ;;  %v24_v3 = vld [vmem:[%s290_s1 + $0x8] sm:$0xff]  ;;  %v221_v5 = vmov 0  }
   0x4   :  { %v23_v2 = vld [vmem:[%s290_s1] sm:$0xff]  ;;  %180 = vmatprep.subr.mxu0 %v25_v1  ;;  %187 = vset.pattern.permute.xlu0 %v221_v5 }
   0x5   :  { %182 = vmatprep.mubr.msk.f32.mxu0 %vm28_vm0, %v23_v2  ;;  %v122_v4 = vld [vmem:[%s292_s3] sm:$0xff]  ;;  %181 = vmatpush3.msra.mxu0 %v25_v1 }
   0x9   :  { %v146_v6 = vld [vmem:[#allocation2] sm:$0x1] }
   0xa   :  { %12 = vsyncpa [#allocation4], 0  ;;  %183 = vmatmul.mubr.msk.f32.vlgmr.msra.gmra.mrb[0].mxu0 %vm28_vm0, %v24_v3  ;;  %126 = vperm.xlu0 %187, %v122_v4   ;;  %v123_v7 = vld [vmem:[%s292_s3 + $0x8] sm:$0xff]  ;;  %v26_v9 = vld [vmem:[%s291_s2] sm:$0xff]  ;;  %vm136_vm1 = vcmask 523264   ;;  %v152_v27 = vlaneseq  ;;  %vm157_vm2 = vcmask 516096  }
   0xb   :  { %188 = vset.pattern.permute.xlu1 %v221_v5  ;;  %v27_v8 = vld [vmem:[%s291_s2 + $0x8] sm:$0xff]  ;;  %s222_s2 = smov [#allocation3]  }
   0xc   :  { %149 = vperm.xlu1 %188, %v146_v6   ;;  %v153_v31 = vshrl.u32 %v152_v27, 7  ;;  %s165_s3 = sshll.u32 %s222_s2, 4  ;;  %s166_s3 = int_to_ptr.vmem [resolvable:$true] %s165_s3 }
   0xd   :  { %s197_s6 = scalar_lea.vmem %s166_s3, 16  ;;  %s201_s7 = scalar_lea.vmem %s166_s3, 32 }
   0xe   :  { %131 = vperm.xlu0 %187, %v123_v7   ;;  %v154_v34 = vsub.s32 0, %v153_v31  ;;  %p198_p0 = scmp.ne.s32.totalorder %s166_s3, %s197_s6  ;;  %p202_p1 = scmp.lt.s32.totalorder %s166_s3, %s166_s3 }
   0xf   :  { %p203_p2 = scmp.lt.s32.totalorder %s201_s7, %s197_s6 }
  0x11   :  { %p204_p3 = por %p203_p2, %p202_p1 }
  0x13   :  { %p205_p4 = pnand %p204_p3, %p198_p0 }
  0x89   :  { %v127_v20 = vpop.permute.xlu0 %126 }
  0x8b   :  { %v150_v35 = vpop.permute.xlu1 %149 }
  0x8c   :  { %v155_v38 = vrot.slane %v150_v35, %v154_v34 }
  0x8d   :  { %v132_v22 = vpop.permute.xlu0 %131 }
  0xdd   :  { %v184_v10 = vpop.f32.mrb[0].mxu0 }
  0xde   :  { %v107_v11 = vadd.f32 %v184_v10, %v27_v8  ;;  %v101_v12 = vpop.f32.mrb[1].mxu0 }
  0xdf   :  { %v102_v13 = vadd.f32 %v101_v12, %v26_v9 }
  0xe0   :  { %v176_v14 = vmul.f32 -1.442695, %v107_v11 }
  0xe1   :  { %v175_v15 = vmul.f32 -1.442695, %v102_v13 }
  0xe2   :  { %189 = vpow2.f32 %v176_v14 }
  0xe3   :  { %191 = vpow2.f32 %v175_v15 }
  0xec   :  { %v190_v16 = vpop.eup %189 }
  0xed   :  { %v192_v17 = vpop.eup %191  ;;  %v117_v18 = vadd.f32 1.0, %v190_v16 }
  0xee   :  { %v116_v19 = vadd.f32 1.0, %v192_v17 }
  0xef   :  { %193 = vrcp.f32 %v117_v18 }
  0xf0   :  { %195 = vrcp.f32 %v116_v19 }
  0xf9   :  { %v194_v21 = vpop.eup %193 }
  0xfa   :  { %v196_v23 = vpop.eup %195  ;;  %v135_v24 = vmul.f32 %v194_v21, %v132_v22 }
  0xfb   :  { %v134_v25 = vmul.f32 %v196_v23, %v127_v20 }
  0xfc   :  { %v138_v26 = vsel %vm136_vm1, %v135_v24, 0.0 }
  0xfd   :  { %v137_v28 = vsel %vm136_vm1, %v134_v25, 0.0 }
  0xfe   :  { %v139_v29 = vadd.f32 %v138_v26, %v137_v28 }
 0x100   :  { %v140_v30 = vrot.slane %v139_v29, 4 }
 0x102   :  { %v141_v32 = vadd.f32 %v140_v30, %v139_v29 }
 0x104   :  { %v142_v33 = vrot.slane %v141_v32, 2 }
 0x106   :  { %v143_v36 = vadd.f32 %v142_v33, %v141_v32 }
 0x108   :  { %v144_v37 = vrot.slane %v143_v36, 1 }
 0x10a   :  { %v145_v39 = vadd.f32 %v144_v37, %v143_v36 }
 0x10c   :  { %v156_v40 = vadd.f32 %v155_v38, %v145_v39 }
 0x10e   :  { %158 = vst.msk [vmem:[#allocation3] sm:$0x1] %vm157_vm2, %v156_v40 }
 0x10f   :  { %208 = shalt.err (!%p205_p4)
}
 0x110   :  { %s209_s10 = scalar_lea.hbm %s294_s5, 16 }
 0x111   :  { %p210_p5 = scmp.ne.s32.totalorder %s294_s5, %s209_s10  ;;  %p213_p6 = scmp.lt.u32.totalorder %s209_s10, %s294_s5 }
 0x113   :  { %p215_p7 = pnand %p213_p6, %p210_p5 }
 0x115   :  { %218 = shalt.err (!%p215_p7)
}
 0x116   :  { %168 = dma.vmem_to_hbm [thread:$0]  %s166_s3, 16, %s294_s5, [#allocation4]  }
 0x117   :  { %219 = dma.done.wait [#allocation4], 16  }
 0x118   :  { %220 = vsyncadd [#allocation4], 4294967280 }
 0x119   :  { %172 = vsyncpa [#allocation4], 1 }

</bundles_post_ra>
